<compile_context>
chip_gen: v7x
topology: tpu7x:2x2x1
jax: 0.10.0
libtpu: 0.0.40
codegen_flags: <defaults>
</compile_context>

<pallas_src>
import functools

import jax
import jax.numpy as jnp
from jax.experimental import pallas as pl
from jax.experimental.pallas import tpu as pltpu

_LANE = 128
_VMEM_TILE_BUDGET = 40 << 20   # double-buffered out+row+col budget; v7x (64 MiB) safe


# ---------------------------------------------------------------------------
# Kernel: one (TM, TN) tile of  G = (normalize(X) @ normalize(X)^T > th)
# ---------------------------------------------------------------------------

def _fused_gram_threshold_kernel(th_ref, rows_ref, cols_ref, g_ref):
    # th_ref   : SMEM (1,)        -- clamped threshold scalar
    # rows_ref : VMEM (1, TM, D)  -- raw feature row block
    # cols_ref : VMEM (1, TN, D)  -- raw feature col block
    # g_ref    : VMEM (1, TM, TN) -- output block
    rows = rows_ref[0].astype(jnp.float32)               # (TM, D)
    cols = cols_ref[0].astype(jnp.float32)               # (TN, D)

    # F.normalize(p=2, dim=-1): x / max(||x||, 1e-12) == x * rsqrt(max(sq, 1e-24)).
    # rsqrt goes to the EUP (otherwise idle); scaling the (tile, D) inputs is far
    # cheaper than rescaling the (TM, TN) output.
    inv_r = jax.lax.rsqrt(jnp.maximum(jnp.sum(rows * rows, axis=-1, keepdims=True), 1e-24))
    inv_c = jax.lax.rsqrt(jnp.maximum(jnp.sum(cols * cols, axis=-1, keepdims=True), 1e-24))

    # NT matmul on the MXU: contract the shared feature axis directly.
    corr = jax.lax.dot_general(
        rows * inv_r, cols * inv_c,
        dimension_numbers=(((1,), (1,)), ((), ())),
        preferred_element_type=jnp.float32,
    )                                                     # (TM, TN)
    g_ref[0] = (corr > th_ref[0]).astype(g_ref.dtype)


# ---------------------------------------------------------------------------
# Wrapper
# ---------------------------------------------------------------------------

def _round_up(x, m):
    return ((x + m - 1) // m) * m


def _choose_tiles(n_pad, d, out_itemsize):
    # Prefer a wide tn (lane-dense, large writeback per grid step) and a large tm
    # (cuts redundant column-block re-reads), under the double-buffered VMEM budget.
    for tm in (512, 256, 128):
        if n_pad % tm:
            continue
        for tn in (1024, 512, 256, 128):
            if n_pad % tn:
                continue
            need = 2 * (tm * tn * out_itemsize + (tm + tn) * d * 4)
            if need <= _VMEM_TILE_BUDGET:
                return tm, tn
    return _LANE, _LANE   # n_pad is always a multiple of 128


@functools.partial(jax.jit, static_argnames=("out_dtype",))
def adaptive_group_estimator(node_features, th, *, out_dtype=jnp.float32):
    """node_features: (B, N, D).  th: scalar parameter (shape ())."""
    B, N, D = node_features.shape
    x = node_features.astype(jnp.float32)

    # Pad N to a multiple of 128: lane-dense tiles, no masked partial stores.
    # Zero-padded rows normalize to zero vectors; padded output is sliced off.
    n_pad = _round_up(max(N, _LANE), _LANE)
    if n_pad != N:
        x = jnp.pad(x, ((0, 0), (0, n_pad - N), (0, 0)))

    out_itemsize = jnp.dtype(out_dtype).itemsize
    tm, tn = _choose_tiles(n_pad, D, out_itemsize)

    # Raise the scoped VMEM limit to cover the double-buffered tiles (+ headroom),
    # staying below v7x's 64 MiB physical VMEM.
    need = 2 * (tm * tn * out_itemsize + (tm + tn) * D * 4)
    vmem_limit = int(min(max(need + (16 << 20), 32 << 20), 56 << 20))

    # clamp(-0.9999, 0.9999) is trivial parameter glue; the scalar rides in SMEM.
    th_clamped = jnp.clip(th, -0.9999, 0.9999).reshape((1,)).astype(jnp.float32)

    # j innermost: the row block index (b, i, 0) is constant across j, so it stays
    # VMEM-resident and only the col block + output are re-DMA'd each step.
    grid = (B, n_pad // tm, n_pad // tn)
    g = pl.pallas_call(
        _fused_gram_threshold_kernel,
        out_shape=jax.ShapeDtypeStruct((B, n_pad, n_pad), out_dtype),
        grid=grid,
        in_specs=[
            pl.BlockSpec(memory_space=pltpu.MemorySpace.SMEM),           # th (1,)
            pl.BlockSpec((1, tm, D), lambda b, i, j: (b, i, 0)),         # row block
            pl.BlockSpec((1, tn, D), lambda b, i, j: (b, j, 0)),         # col block
        ],
        out_specs=pl.BlockSpec((1, tm, tn), lambda b, i, j: (b, i, j)),
        compiler_params=pltpu.CompilerParams(
            dimension_semantics=("parallel", "parallel", "parallel"),
            vmem_limit_bytes=vmem_limit,
        ),
    )(th_clamped, x, x)

    if n_pad != N:
        g = g[:, :N, :N]
    return g


# ---------------------------------------------------------------------------
# Pure-JAX reference (mirrors the PyTorch forward)
# ---------------------------------------------------------------------------

def _reference_corr(node_features):
    x = node_features.astype(jnp.float32)
    sq = jnp.sum(x * x, axis=2, keepdims=True)
    temp = x * jax.lax.rsqrt(jnp.maximum(sq, 1e-24))
    return jnp.einsum("bnd,bmd->bnm", temp, temp)


if __name__ == "__main__":
    key = jax.random.PRNGKey(0)
    B, N, D = 2, 16, 32
    node_features = jax.random.normal(key, (B, N, D), dtype=jnp.float32)

    # Deterministic parameter init, matching nn.Parameter(torch.Tensor([0.5])).
    th = jnp.float32(0.5)

    # TODO(synk): only the forward pass of the straight-through estimator is
    # implemented; the custom STE backward rules (types 1/2/3) are training-only.
    g = adaptive_group_estimator(node_features, th)
    g = jax.block_until_ready(g)

    corr_ref = _reference_corr(node_features)
    thc = jnp.clip(th, -0.9999, 0.9999)
    g_ref = (corr_ref > thc).astype(jnp.float32)

    assert g.shape == (B, N, N)
    assert g.dtype == jnp.float32
    # Exact match except where corr sits within an ulp-ish band of th (different
    # f32 accumulation order between MXU and XLA can flip those elements).
    near_th = jnp.abs(corr_ref - thc) < 1e-5
    assert bool(jnp.all(jnp.where(near_th, True, g == g_ref))), "mismatch vs reference"

    print("KERNEL_OK")
</pallas_src>

<mosaic_0001>
module attributes {stable_mosaic.version = 11 : i64} {
  func.func @_fused_gram_threshold_kernel(%arg0: i32, %arg1: i32, %arg2: i32, %arg3: memref<1xf32, #tpu.memory_space<smem>>, %arg4: memref<1x128x32xf32, #tpu.memory_space<vmem>>, %arg5: memref<1x128x32xf32, #tpu.memory_space<vmem>>, %arg6: memref<1x128x128xf32, #tpu.memory_space<vmem>>) attributes {dimension_semantics = [#tpu.dimension_semantics<parallel>, #tpu.dimension_semantics<parallel>, #tpu.dimension_semantics<parallel>], iteration_bounds = array<i64: 2, 1, 1>, scalar_prefetch = 0 : i64, scratch_operands = 0 : i64, tpu.core_type = #tpu.core_type<tc>, window_params = [{transform_indices = @transform_0, window_bounds = array<i64: 1>}, {transform_indices = @transform_1, window_bounds = array<i64: 1, 128, 32>}, {transform_indices = @transform_2, window_bounds = array<i64: 1, 128, 32>}, {transform_indices = @transform_3, window_bounds = array<i64: 1, 128, 128>}]} {
    %c0 = arith.constant 0 : index
    %c0_0 = arith.constant 0 : index
    %c0_1 = arith.constant 0 : index
    %0 = vector.load %arg4[%c0, %c0_0, %c0_1] : memref<1x128x32xf32, #tpu.memory_space<vmem>>, vector<1x128x32xf32>
    %1 = vector.shape_cast %0 : vector<1x128x32xf32> to vector<128x32xf32>
    %c0_2 = arith.constant 0 : index
    %c0_3 = arith.constant 0 : index
    %c0_4 = arith.constant 0 : index
    %2 = vector.load %arg5[%c0_2, %c0_3, %c0_4] : memref<1x128x32xf32, #tpu.memory_space<vmem>>, vector<1x128x32xf32>
    %3 = vector.shape_cast %2 : vector<1x128x32xf32> to vector<128x32xf32>
    %4 = arith.mulf %1, %1 : vector<128x32xf32>
    %cst = arith.constant dense<0.000000e+00> : vector<128xf32>
    %5 = vector.multi_reduction <add>, %4, %cst [1] : vector<128x32xf32> to vector<128xf32>
    %6 = vector.shape_cast %5 : vector<128xf32> to vector<128x1xf32>
    %cst_5 = arith.constant 1.000000e-24 : f32
    %7 = vector.broadcast %cst_5 : f32 to vector<128x1xf32>
    %8 = arith.maximumf %6, %7 : vector<128x1xf32>
    %9 = math.rsqrt %8 : vector<128x1xf32>
    %10 = arith.mulf %3, %3 : vector<128x32xf32>
    %cst_6 = arith.constant dense<0.000000e+00> : vector<128xf32>
    %11 = vector.multi_reduction <add>, %10, %cst_6 [1] : vector<128x32xf32> to vector<128xf32>
    %12 = vector.shape_cast %11 : vector<128xf32> to vector<128x1xf32>
    %cst_7 = arith.constant 1.000000e-24 : f32
    %13 = vector.broadcast %cst_7 : f32 to vector<128x1xf32>
    %14 = arith.maximumf %12, %13 : vector<128x1xf32>
    %15 = math.rsqrt %14 : vector<128x1xf32>
    %16 = vector.broadcast %9 : vector<128x1xf32> to vector<128x32xf32>
    %17 = arith.mulf %1, %16 : vector<128x32xf32>
    %18 = vector.broadcast %15 : vector<128x1xf32> to vector<128x32xf32>
    %19 = arith.mulf %3, %18 : vector<128x32xf32>
    %cst_8 = arith.constant dense<0.000000e+00> : vector<128x128xf32>
    %20 = tpu.matmul %17, %19, %cst_8 {dimension_numbers = #tpu.dot_dimension_numbers<[1], [1], [0], [0], [0, 0, 1, 0], [], []>} : vector<128x32xf32>, vector<128x32xf32>, vector<128x128xf32> -> vector<128x128xf32>
    %c0_9 = arith.constant 0 : index
    %21 = memref.load %arg3[%c0_9] : memref<1xf32, #tpu.memory_space<smem>>
    %22 = vector.broadcast %21 : f32 to vector<128x128xf32>
    %23 = arith.cmpf ogt, %20, %22 : vector<128x128xf32>
    %24 = arith.extui %23 : vector<128x128xi1> to vector<128x128xi32>
    %25 = arith.sitofp %24 : vector<128x128xi32> to vector<128x128xf32>
    %c0_10 = arith.constant 0 : index
    %c0_11 = arith.constant 0 : index
    %c0_12 = arith.constant 0 : index
    %26 = vector.load %arg6[%c0_10, %c0_11, %c0_12] : memref<1x128x128xf32, #tpu.memory_space<vmem>>, vector<1x128x128xf32>
    %27 = vector.shape_cast %26 : vector<1x128x128xf32> to vector<128x128xf32>
    %28 = vector.shape_cast %25 : vector<128x128xf32> to vector<1x128x128xf32>
    tpu.vector_store %arg6[%c0_10, %c0_11, %c0_12], %28 {strides = array<i32>} : memref<1x128x128xf32, #tpu.memory_space<vmem>>, vector<1x128x128xf32>,
    return
  }
  func.func @transform_0(%arg0: i32, %arg1: i32, %arg2: i32) -> i32 {
    %c0_i32 = arith.constant 0 : i32
    %c0_i32_0 = arith.constant 0 : i32
    return %c0_i32 : i32
  }
  func.func @transform_1(%arg0: i32, %arg1: i32, %arg2: i32) -> (i32, i32, i32) {
    %c0_i32 = arith.constant 0 : i32
    %c0_i32_0 = arith.constant 0 : i32
    return %arg0, %arg1, %c0_i32 : i32, i32, i32
  }
  func.func @transform_2(%arg0: i32, %arg1: i32, %arg2: i32) -> (i32, i32, i32) {
    %c0_i32 = arith.constant 0 : i32
    %c0_i32_0 = arith.constant 0 : i32
    return %arg0, %arg2, %c0_i32 : i32, i32, i32
  }
  func.func @transform_3(%arg0: i32, %arg1: i32, %arg2: i32) -> (i32, i32, i32) {
    %c0_i32 = arith.constant 0 : i32
    return %arg0, %arg1, %arg2 : i32, i32, i32
  }
}

</mosaic_0001>

<bundles_post_ra>
// kernel: adaptive_group_estimator.1
= control target key start
LH: loop header
LB: loop body
LE: loop exit
PB: predicated region body
PF: predicated region fallthrough
CT: control target
= control target key end

     0   :  { %s1297_s14 = smov 0   ;;  %s1299_s15 = smov 0   ;;  %s1691_s0 = inlined_call_operand.<no memory space> [shape: f32[1], index: 0, kind: input, shape index: {}]   ;;  %s1692_s1 = inlined_call_operand.vmem [shape: f32[2,128,32], index: 1, kind: input, shape index: {}, may-alias: {1,2}]   ;;  %s1693_s2 = inlined_call_operand.vmem [shape: f32[2,128,32], index: 2, kind: input, shape index: {}, may-alias: {1,2}]   ;;  %s1694_s3 = inlined_call_operand.vmem [shape: f32[2,128,128], index: 3, kind: output, shape index: {}]  }
   0x1   :  { %8 = sst [smem:[#allocation2]] %s1691_s0  ;;  %s1301_s16 = smov 0  }
   0x2 LB: > { %s33_s0 = sadd.s32 1, %s1267_s15  ;;  %p948_p0 = scmp.ge.s32.totalorder %s1271_s16, 1  ;;  %s1271_s16 = sphi %s1301_s16, %s14_s16   ;;  %s1267_s15 = sphi %s1299_s15, %s1698_s15   ;;  %s1263_s14 = sphi %s1297_s14, %s1697_s14  }
   0x3   : > { %p35_p1 = scmp.ge.s32.totalorder %s33_s0, 2  ;;  %p185_p2 = scmp.lt.s32.totalorder %s1271_s16, 3 }
   0x5   : > { %s1700_s0 = smov (%p35_p1, %s33_s0), 0  ;;  %p186_p3 = pnand %p948_p0, %p185_p2 }
   0x6   : > { %p230_p4 = scmp.lt.s32.totalorder (!%p186_p3), %s1263_s14, 1  ;;  %vm310_vm0 = vcmask (!%p186_p3), 261120   ;;  %s760_s24 = sld [smem:[#allocation2]] (!%p186_p3) }
   0x7   : > { %189 = sbr.rel (%p186_p3) target bundleno = 476 (0x1dc), region = 32  ;;  %vm1526_vm1 = vmpackc.low (!%p186_p3), %vm310_vm0, %vm310_vm0 }
   0xe   : > { %s1702_s14 = smov (!%p230_p4, %s1263_s14), 1 }
   0xf   : > { %s1315_s17 = sshll.u32 %s1702_s14, 7 }
  0x10   : > { %s1321_s20 = scalar_lea.vmem %s1693_s2, %s1315_s17  ;;  %s1415_s23 = scalar_lea.vmem %s1692_s1, %s1315_s17 }
  0x11   : > { %v1324_v0 = vld [vmem:[%s1321_s20] sm:$0xff]  ;;  %v1327_v1 = vld [vmem:[%s1321_s20 + $0x10] sm:$0xff]  ;;  %v1330_v2 = vld [vmem:[%s1321_s20 + $0x8] sm:$0xff]  ;;  %s1648_s27 = scalar_lea.vmem %s1694_s3, %s1315_s17 }
  0x12   : > { %v391_v3 = vmul.f32 %v1324_v0, %v1324_v0  ;;  %v393_v4 = vmul.f32 %v1327_v1, %v1327_v1  ;;  %v392_v5 = vmul.f32 %v1330_v2, %v1330_v2  ;;  %v1339_v6 = vld [vmem:[%s1321_s20 + $0x18] sm:$0xff]  ;;  %v1344_v8 = vld [vmem:[%s1321_s20 + $0x28] sm:$0xff]  ;;  %v1347_v9 = vld [vmem:[%s1321_s20 + $0x20] sm:$0xff] }
  0x13   : > { %v394_v7 = vmul.f32 %v1339_v6, %v1339_v6  ;;  %v396_v14 = vmul.f32 %v1344_v8, %v1344_v8  ;;  %v395_v15 = vmul.f32 %v1347_v9, %v1347_v9  ;;  %v1358_v16 = vld [vmem:[%s1321_s20 + $0x38] sm:$0xff]  ;;  %v1361_v17 = vld [vmem:[%s1321_s20 + $0x30] sm:$0xff]  ;;  %v1370_v22 = vld [vmem:[%s1321_s20 + $0x48] sm:$0xff] }
  0x14   : > { %v407_v10 = vsel %vm310_vm0, %v391_v3, 0.0  ;;  %v413_v11 = vsel %vm310_vm0, %v393_v4, 0.0  ;;  %v410_v12 = vsel %vm310_vm0, %v392_v5, 0.0  ;;  %v398_v20 = vmul.f32 %v1358_v16, %v1358_v16  ;;  %v1373_v23 = vld [vmem:[%s1321_s20 + $0x40] sm:$0xff]  ;;  %v1382_v28 = vld [vmem:[%s1321_s20 + $0x58] sm:$0xff]  ;;  %v1385_v29 = vld [vmem:[%s1321_s20 + $0x50] sm:$0xff] }
  0x15   : > { %408 = vadd.xlane.f32.xlu0 %v407_v10  ;;  %414 = vadd.xlane.f32.xlu1 %v413_v11  ;;  %v416_v13 = vsel %vm310_vm0, %v394_v7, 0.0  ;;  %v422_v18 = vsel %vm310_vm0, %v396_v14, 0.0  ;;  %v419_v19 = vsel %vm310_vm0, %v395_v15, 0.0  ;;  %v397_v21 = vmul.f32 %v1361_v17, %v1361_v17  ;;  %v1394_v34 = vld [vmem:[%s1321_s20 + $0x68] sm:$0xff]  ;;  %v1397_v35 = vld [vmem:[%s1321_s20 + $0x60] sm:$0xff]  ;;  %v1406_v40 = vld [vmem:[%s1321_s20 + $0x78] sm:$0xff] }
  0x16   : > { %v428_v24 = vsel %vm310_vm0, %v398_v20, 0.0  ;;  %v400_v26 = vmul.f32 %v1370_v22, %v1370_v22  ;;  %v399_v27 = vmul.f32 %v1373_v23, %v1373_v23  ;;  %v402_v32 = vmul.f32 %v1382_v28, %v1382_v28  ;;  %v1409_v41 = vld [vmem:[%s1321_s20 + $0x70] sm:$0xff]  ;;  %v1424_v46 = vld [vmem:[%s1415_s23 + $0x40] sm:$0xff]  ;;  %v1436_v52 = vld [vmem:[%s1415_s23 + $0x48] sm:$0xff] }
  0x17   : > { %v425_v25 = vsel %vm310_vm0, %v397_v21, 0.0  ;;  %v401_v33 = vmul.f32 %v1385_v29, %v1385_v29  ;;  %v404_v38 = vmul.f32 %v1394_v34, %v1394_v34  ;;  %v403_v39 = vmul.f32 %v1397_v35, %v1397_v35  ;;  %v1427_v47 = vld [vmem:[%s1415_s23] sm:$0xff]  ;;  %v1439_v53 = vld [vmem:[%s1415_s23 + $0x8] sm:$0xff]  ;;  %v1448_v58 = vld [vmem:[%s1415_s23 + $0x50] sm:$0xff] }
  0x18   : > { %v434_v30 = vsel %vm310_vm0, %v400_v26, 0.0  ;;  %v431_v31 = vsel %vm310_vm0, %v399_v27, 0.0  ;;  %v440_v36 = vsel %vm310_vm0, %v402_v32, 0.0  ;;  %v406_v44 = vmul.f32 %v1406_v40, %v1406_v40  ;;  %v1451_v59 = vld [vmem:[%s1415_s23 + $0x10] sm:$0xff]  ;;  %v1460_v3 = vld [vmem:[%s1415_s23 + $0x58] sm:$0xff]  ;;  %v1484_v20 = vld [vmem:[%s1415_s23 + $0x68] sm:$0xff] }
  0x19   : > { %411 = vadd.xlane.f32.xlu0 %v410_v12  ;;  %417 = vadd.xlane.f32.xlu1 %v416_v13  ;;  %v437_v37 = vsel %vm310_vm0, %v401_v33, 0.0  ;;  %v446_v42 = vsel %vm310_vm0, %v404_v38, 0.0  ;;  %v443_v43 = vsel %vm310_vm0, %v403_v39, 0.0  ;;  %v405_v45 = vmul.f32 %v1409_v41, %v1409_v41  ;;  %v1463_v4 = vld [vmem:[%s1415_s23 + $0x18] sm:$0xff]  ;;  %v1472_v12 = vld [vmem:[%s1415_s23 + $0x60] sm:$0xff]  ;;  %v1487_v21 = vld [vmem:[%s1415_s23 + $0x28] sm:$0xff] }
  0x1a   : > { %v452_v48 = vsel %vm310_vm0, %v406_v44, 0.0  ;;  %v302_v50 = vmul.f32 %v1424_v46, %v1424_v46  ;;  %v294_v51 = vmul.f32 %v1427_v47, %v1427_v47  ;;  %v303_v56 = vmul.f32 %v1436_v52, %v1436_v52  ;;  %v1475_v13 = vld [vmem:[%s1415_s23 + $0x20] sm:$0xff]  ;;  %v1508_v38 = vld [vmem:[%s1415_s23 + $0x78] sm:$0xff] }
  0x1b   : > { %v449_v49 = vsel %vm310_vm0, %v405_v45, 0.0  ;;  %v295_v57 = vmul.f32 %v1439_v53, %v1439_v53  ;;  %v304_v62 = vmul.f32 %v1448_v58, %v1448_v58  ;;  %v296_v63 = vmul.f32 %v1451_v59, %v1451_v59  ;;  %v1511_v39 = vld [vmem:[%s1415_s23 + $0x38] sm:$0xff] }
  0x1c   : > { %v335_v54 = vsel %vm310_vm0, %v302_v50, 0.0  ;;  %v311_v55 = vsel %vm310_vm0, %v294_v51, 0.0  ;;  %v338_v60 = vsel %vm310_vm0, %v303_v56, 0.0  ;;  %v305_v10 = vmul.f32 %v1460_v3, %v1460_v3 }
  0x1d   : > { %423 = vadd.xlane.f32.xlu1 %v422_v18  ;;  %420 = vadd.xlane.f32.xlu0 %v419_v19  ;;  %v314_v61 = vsel %vm310_vm0, %v295_v57, 0.0  ;;  %v341_v5 = vsel %vm310_vm0, %v304_v62, 0.0  ;;  %v317_v7 = vsel %vm310_vm0, %v296_v63, 0.0  ;;  %v297_v11 = vmul.f32 %v1463_v4, %v1463_v4 }
  0x1e   : > { %v344_v14 = vsel %vm310_vm0, %v305_v10, 0.0  ;;  %v306_v18 = vmul.f32 %v1472_v12, %v1472_v12  ;;  %v298_v19 = vmul.f32 %v1475_v13, %v1475_v13  ;;  %v307_v26 = vmul.f32 %v1484_v20, %v1484_v20 }
  0x1f   : > { %v320_v15 = vsel %vm310_vm0, %v297_v11, 0.0  ;;  %v299_v27 = vmul.f32 %v1487_v21, %v1487_v21  ;;  %v309_v44 = vmul.f32 %v1508_v38, %v1508_v38  ;;  %v301_v45 = vmul.f32 %v1511_v39, %v1511_v39 }
  0x20   : > { %v350_v32 = vsel %vm310_vm0, %v307_v26, 0.0 }
  0x21   : > { %429 = vadd.xlane.f32.xlu1 %v428_v24  ;;  %426 = vadd.xlane.f32.xlu0 %v425_v25  ;;  %v347_v24 = vsel %vm310_vm0, %v306_v18, 0.0  ;;  %v323_v25 = vsel %vm310_vm0, %v298_v19, 0.0  ;;  %v326_v33 = vsel %vm310_vm0, %v299_v27, 0.0 }
  0x25   : > { %435 = vadd.xlane.f32.xlu1 %v434_v30  ;;  %432 = vadd.xlane.f32.xlu0 %v431_v31  ;;  %v1496_v30 = vld [vmem:[%s1415_s23 + $0x70] sm:$0xff] }
  0x26   : > { %v1499_v31 = vld [vmem:[%s1415_s23 + $0x30] sm:$0xff] }
  0x29   : > { %441 = vadd.xlane.f32.xlu1 %v440_v36  ;;  %438 = vadd.xlane.f32.xlu0 %v437_v37  ;;  %v308_v36 = vmul.f32 %v1496_v30, %v1496_v30  ;;  %v300_v37 = vmul.f32 %v1499_v31, %v1499_v31 }
  0x2d   : > { %447 = vadd.xlane.f32.xlu1 %v446_v42  ;;  %444 = vadd.xlane.f32.xlu0 %v443_v43  ;;  %v353_v42 = vsel %vm310_vm0, %v308_v36, 0.0  ;;  %v329_v43 = vsel %vm310_vm0, %v300_v37, 0.0 }
  0x31   : > { %453 = vadd.xlane.f32.xlu1 %v452_v48  ;;  %450 = vadd.xlane.f32.xlu0 %v449_v49  ;;  %v356_v48 = vsel %vm310_vm0, %v309_v44, 0.0  ;;  %v332_v49 = vsel %vm310_vm0, %v301_v45, 0.0 }
  0x35   : > { %336 = vadd.xlane.f32.xlu1 %v335_v54  ;;  %312 = vadd.xlane.f32.xlu0 %v311_v55 }
  0x39   : > { %339 = vadd.xlane.f32.xlu1 %v338_v60  ;;  %315 = vadd.xlane.f32.xlu0 %v314_v61 }
  0x3d   : > { %342 = vadd.xlane.f32.xlu1 %v341_v5  ;;  %318 = vadd.xlane.f32.xlu0 %v317_v7 }
  0x41   : > { %345 = vadd.xlane.f32.xlu1 %v344_v14  ;;  %321 = vadd.xlane.f32.xlu0 %v320_v15 }
  0x45   : > { %348 = vadd.xlane.f32.xlu1 %v347_v24  ;;  %324 = vadd.xlane.f32.xlu0 %v323_v25 }
  0x49   : > { %351 = vadd.xlane.f32.xlu1 %v350_v32  ;;  %327 = vadd.xlane.f32.xlu0 %v326_v33 }
  0x4d   : > { %354 = vadd.xlane.f32.xlu1 %v353_v42  ;;  %330 = vadd.xlane.f32.xlu0 %v329_v43 }
  0x51   : > { %357 = vadd.xlane.f32.xlu1 %v356_v48  ;;  %333 = vadd.xlane.f32.xlu0 %v332_v49 }
  0xa2   : > { %v409_v50 = vpop.xlane.xlu0 %408  ;;  %v415_v51 = vpop.xlane.xlu1 %414 }
  0xa3   : > { %v455_v54 = vmax.f32 %v409_v50, 1e-24  ;;  %v457_v55 = vmax.f32 %v415_v51, 1e-24 }
  0xa5   : > { %1185 = vrsqrt.f32 %v457_v55 }
  0xa6   : > { %v412_v56 = vpop.xlane.xlu0 %411  ;;  %v418_v57 = vpop.xlane.xlu1 %417  ;;  %1187 = vrsqrt.f32 %v455_v54 }
  0xa7   : > { %v456_v60 = vmax.f32 %v412_v56, 1e-24  ;;  %v458_v61 = vmax.f32 %v418_v57, 1e-24 }
  0xa9   : > { %1189 = vrsqrt.f32 %v456_v60 }
  0xaa   : > { %1191 = vrsqrt.f32 %v458_v61  ;;  %v424_v62 = vpop.xlane.xlu1 %423  ;;  %v421_v63 = vpop.xlane.xlu0 %420 }
  0xab   : > { %v460_v5 = vmax.f32 %v424_v62, 1e-24  ;;  %v459_v7 = vmax.f32 %v421_v63, 1e-24 }
  0xad   : > { %1193 = vrsqrt.f32 %v460_v5 }
  0xae   : > { %1195 = vrsqrt.f32 %v459_v7  ;;  %v430_v10 = vpop.xlane.xlu1 %429  ;;  %v427_v11 = vpop.xlane.xlu0 %426 }
  0xaf   : > { %v1186_v14 = vpop.eup %1185  ;;  %v462_v15 = vmax.f32 %v430_v10, 1e-24  ;;  %v461_v19 = vmax.f32 %v427_v11, 1e-24 }
  0xb0   : > { %v1188_v18 = vpop.eup %1187  ;;  %v505_v27 = vmul.f32 %v1186_v14, %v1327_v1 }
  0xb1   : > { %v503_v33 = vmul.f32 %v1188_v18, %v1324_v0  ;;  %1197 = vrsqrt.f32 %v462_v15 }
  0xb2   : > { %v436_v24 = vpop.xlane.xlu1 %435  ;;  %v433_v25 = vpop.xlane.xlu0 %432  ;;  %1199 = vrsqrt.f32 %v461_v19 }
  0xb3   : > { %v1190_v26 = vpop.eup %1189  ;;  %v464_v0 = vmax.f32 %v436_v24, 1e-24 }
  0xb4   : > { %v1192_v32 = vpop.eup %1191  ;;  %v504_v36 = vmul.f32 %v1190_v26, %v1330_v2  ;;  %v463_v2 = vmax.f32 %v433_v25, 1e-24 }
  0xb5   : > { %v506_v42 = vmul.f32 %v1192_v32, %v1339_v6  ;;  %1201 = vrsqrt.f32 %v464_v0 }
  0xb6   : > { %v1096_v43 = vpack.c.bf16 %v504_v36, %v503_v33  ;;  %v442_v44 = vpop.xlane.xlu1 %441  ;;  %v439_v45 = vpop.xlane.xlu0 %438  ;;  %1203 = vrsqrt.f32 %v463_v2 }
  0xb7   : > { %v1194_v48 = vpop.eup %1193  ;;  %v1102_v1 = vpack.c.bf16 %v506_v42, %v505_v27  ;;  %v466_v62 = vmax.f32 %v442_v44, 1e-24  ;;  %v465_v63 = vmax.f32 %v439_v45, 1e-24 }
  0xb8   : > { %v1196_v49 = vpop.eup %1195  ;;  %1098 = vmatprep.subr.msk.bf16.mxu0 %vm1526_vm1, %v1096_v43  ;;  %1144 = vmatprep.subr.msk.bf16.mxu1 %vm1526_vm1, %v1096_v43  ;;  %v508_v50 = vmul.f32 %v1194_v48, %v1344_v8 }
  0xb9   : > { %1101 = vmatpush3.bf16.xpose.msk.msra.mxu0 %vm1526_vm1, %v1096_v43  ;;  %1152 = vmatpush3.bf16.xpose.msk.msra.mxu1 %vm1526_vm1, %v1096_v43  ;;  %v507_v6 = vmul.f32 %v1196_v49, %v1347_v9  ;;  %1205 = vrsqrt.f32 %v466_v62 }
  0xba   : > { %1104 = vmatprep.subr.msk.bf16.mxu0 %vm1526_vm1, %v1102_v1  ;;  %1145 = vmatprep.subr.msk.bf16.mxu1 %vm1526_vm1, %v1102_v1  ;;  %v448_v51 = vpop.xlane.xlu1 %447  ;;  %v445_v54 = vpop.xlane.xlu0 %444  ;;  %1207 = vrsqrt.f32 %v465_v63 }
  0xbb   : > { %v1198_v55 = vpop.eup %1197  ;;  %v1108_v56 = vpack.c.bf16 %v508_v50, %v507_v6  ;;  %v468_v24 = vmax.f32 %v448_v51, 1e-24 }
  0xbc   : > { %v1200_v61 = vpop.eup %1199  ;;  %v510_v9 = vmul.f32 %v1198_v55, %v1358_v16  ;;  %v467_v16 = vmax.f32 %v445_v54, 1e-24 }
  0xbd   : > { %v509_v8 = vmul.f32 %v1200_v61, %v1361_v17 }
  0xbe   : > { %v454_v57 = vpop.xlane.xlu1 %453  ;;  %v451_v60 = vpop.xlane.xlu0 %450 }
  0xbf   : > { %v1202_v14 = vpop.eup %1201  ;;  %v1114_v15 = vpack.c.bf16 %v510_v9, %v509_v8 }
  0xc0   : > { %v1204_v18 = vpop.eup %1203  ;;  %v512_v26 = vmul.f32 %v1202_v14, %v1370_v22  ;;  %v470_v22 = vmax.f32 %v454_v57, 1e-24 }
  0xc1   : > { %1107 = vmatpush3.bf16.xpose.msk.msra.mxu0 %vm1526_vm1, %v1102_v1  ;;  %1153 = vmatpush3.bf16.xpose.msk.msra.mxu1 %vm1526_vm1, %v1102_v1  ;;  %v511_v17 = vmul.f32 %v1204_v18, %v1373_v23 }
  0xc2   : > { %1110 = vmatprep.subr.msk.bf16.mxu0 %vm1526_vm1, %v1108_v56  ;;  %1146 = vmatprep.subr.msk.bf16.mxu1 %vm1526_vm1, %v1108_v56  ;;  %v337_v5 = vpop.xlane.xlu1 %336  ;;  %v313_v7 = vpop.xlane.xlu0 %312 }
  0xc3   : > { %v367_v10 = vmax.f32 %v337_v5, 1e-24  ;;  %v359_v11 = vmax.f32 %v313_v7, 1e-24  ;;  %v1206_v27 = vpop.eup %1205  ;;  %v1120_v36 = vpack.c.bf16 %v512_v26, %v511_v17 }
  0xc4   : > { %v1208_v33 = vpop.eup %1207  ;;  %v514_v1 = vmul.f32 %v1206_v27, %v1382_v28 }
  0xc5   : > { %1209 = vrsqrt.f32 %v367_v10  ;;  %v513_v48 = vmul.f32 %v1208_v33, %v1385_v29 }
  0xc6   : > { %1211 = vrsqrt.f32 %v359_v11  ;;  %v340_v19 = vpop.xlane.xlu1 %339  ;;  %v1555_v25 = vpop.xlane.xlu0 %315 }
  0xc7   : > { %1213 = vrsqrt.f32 %v468_v24  ;;  %v368_v61 = vmax.f32 %v340_v19, 1e-24 }
  0xc8   : > { %1215 = vrsqrt.f32 %v467_v16 }
  0xc9   : > { %1113 = vmatpush3.bf16.xpose.msk.msra.mxu0 %vm1526_vm1, %v1108_v56  ;;  %1154 = vmatpush3.bf16.xpose.msk.msra.mxu1 %vm1526_vm1, %v1108_v56  ;;  %1217 = vrsqrt.f32 %v470_v22 }
  0xca   : > { %1116 = vmatprep.subr.msk.bf16.mxu0 %vm1526_vm1, %v1114_v15  ;;  %1147 = vmatprep.subr.msk.bf16.mxu1 %vm1526_vm1, %v1114_v15  ;;  %v343_v32 = vpop.xlane.xlu1 %342  ;;  %v319_v42 = vpop.xlane.xlu0 %318 }
  0xcb   : > { %v361_v8 = vmax.f32 %v319_v42, 1e-24 }
  0xce   : > { %v346_v49 = vpop.xlane.xlu1 %345  ;;  %v322_v0 = vpop.xlane.xlu0 %321 }
  0xcf   : > { %v1210_v43 = vpop.eup %1209  ;;  %v370_v5 = vmax.f32 %v346_v49, 1e-24  ;;  %v362_v10 = vmax.f32 %v322_v0, 1e-24 }
  0xd0   : > { %v1212_v44 = vpop.eup %1211  ;;  %v495_v45 = vmul.f32 %v1210_v43, %v1424_v46  ;;  %v469_v46 = vmax.f32 %v451_v60, 1e-24 }
  0xd1   : > { %1119 = vmatpush3.bf16.xpose.msk.msra.mxu0 %vm1526_vm1, %v1114_v15  ;;  %1155 = vmatpush3.bf16.xpose.msk.msra.mxu1 %vm1526_vm1, %v1114_v15  ;;  %v487_v23 = vmul.f32 %v1212_v44, %v1427_v47  ;;  %v1214_v2 = vpop.eup %1213  ;;  %v1126_v47 = vpack.c.bf16 %v514_v1, %v513_v48 }
  0xd2   : > { %1122 = vmatprep.subr.msk.bf16.mxu0 %vm1526_vm1, %v1120_v36  ;;  %1148 = vmatprep.subr.msk.bf16.mxu1 %vm1526_vm1, %v1120_v36  ;;  %v1216_v6 = vpop.eup %1215  ;;  %1219 = vrsqrt.f32 %v469_v46  ;;  %v349_v29 = vpop.xlane.xlu1 %348  ;;  %v516_v50 = vmul.f32 %v1214_v2, %v1394_v34  ;;  %v360_v34 = vmax.f32 %v1555_v25, 1e-24 }
  0xd3   : > { %1084 = vmatprep.mubr.msk.f32.mxu1 %vm310_vm0, %v495_v45  ;;  %1072 = vmatprep.mubr.msk.f32.mxu0 %vm310_vm0, %v487_v23  ;;  %v515_v28 = vmul.f32 %v1216_v6, %v1397_v35  ;;  %v325_v51 = vpop.xlane.xlu0 %324  ;;  %v1218_v56 = vpop.eup %1217  ;;  %v369_v35 = vmax.f32 %v343_v32, 1e-24  ;;  %1221 = vrsqrt.f32 %v368_v61  ;;  %v371_v11 = vmax.f32 %v349_v29, 1e-24 }
  0xd4   : > { %v518_v63 = vmul.f32 %v1218_v56, %v1406_v40  ;;  %1223 = vrsqrt.f32 %v360_v34  ;;  %v363_v15 = vmax.f32 %v325_v51, 1e-24 }
  0xd5   : > { %v1132_v54 = vpack.c.bf16 %v516_v50, %v515_v28  ;;  %1225 = vrsqrt.f32 %v369_v35 }
  0xd6   : > { %v352_v55 = vpop.xlane.xlu1 %351  ;;  %1227 = vrsqrt.f32 %v361_v8 }
  0xd7   : > { %v328_v57 = vpop.xlane.xlu0 %327  ;;  %1229 = vrsqrt.f32 %v370_v5  ;;  %v372_v40 = vmax.f32 %v352_v55, 1e-24 }
  0xd8   : > { %1231 = vrsqrt.f32 %v362_v10  ;;  %v364_v25 = vmax.f32 %v328_v57, 1e-24 }
  0xd9   : > { %1125 = vmatpush3.bf16.xpose.msk.msra.mxu0 %vm1526_vm1, %v1120_v36  ;;  %1156 = vmatpush3.bf16.xpose.msk.msra.mxu1 %vm1526_vm1, %v1120_v36  ;;  %1233 = vrsqrt.f32 %v371_v11 }
  0xda   : > { %1128 = vmatprep.subr.msk.bf16.mxu0 %vm1526_vm1, %v1126_v47  ;;  %1149 = vmatprep.subr.msk.bf16.mxu1 %vm1526_vm1, %v1126_v47  ;;  %v355_v9 = vpop.xlane.xlu1 %354  ;;  %1235 = vrsqrt.f32 %v363_v15 }
  0xdb   : > { %v331_v7 = vpop.xlane.xlu0 %330  ;;  %1237 = vrsqrt.f32 %v372_v40 }
  0xdc   : > { %v1220_v60 = vpop.eup %1219  ;;  %v365_v19 = vmax.f32 %v331_v7, 1e-24 }
  0xdd   : > { %v517_v62 = vmul.f32 %v1220_v60, %v1409_v41  ;;  %v373_v41 = vmax.f32 %v355_v9, 1e-24  ;;  %v1222_v26 = vpop.eup %1221 }
  0xde   : > { %v358_v18 = vpop.xlane.xlu1 %357  ;;  %v1224_v27 = vpop.eup %1223  ;;  %v496_v45 = vmul.f32 %v1222_v26, %v1436_v52 }
  0xdf   : > { %v1138_v14 = vpack.c.bf16 %v518_v63, %v517_v62  ;;  %v334_v24 = vpop.xlane.xlu0 %333  ;;  %v374_v16 = vmax.f32 %v358_v18, 1e-24  ;;  %1239 = vrsqrt.f32 %v373_v41  ;;  %v1226_v32 = vpop.eup %1225  ;;  %v488_v44 = vmul.f32 %v1224_v27, %v1439_v53 }
  0xe0   : > { %v366_v17 = vmax.f32 %v334_v24, 1e-24  ;;  %1241 = vrsqrt.f32 %v365_v19  ;;  %v1228_v33 = vpop.eup %1227  ;;  %v497_v48 = vmul.f32 %v1226_v32, %v1448_v58 }
  0xe1   : > { %1131 = vmatpush3.bf16.xpose.msk.msra.mxu0 %vm1526_vm1, %v1126_v47  ;;  %1157 = vmatpush3.bf16.xpose.msk.msra.mxu1 %vm1526_vm1, %v1126_v47  ;;  %1243 = vrsqrt.f32 %v364_v25  ;;  %v1230_v36 = vpop.eup %1229  ;;  %v489_v22 = vmul.f32 %v1228_v33, %v1451_v59 }
  0xe2   : > { %1134 = vmatprep.subr.msk.bf16.mxu0 %vm1526_vm1, %v1132_v54  ;;  %1150 = vmatprep.subr.msk.bf16.mxu1 %vm1526_vm1, %v1132_v54  ;;  %1245 = vrsqrt.f32 %v374_v16  ;;  %v1232_v42 = vpop.eup %1231  ;;  %v498_v52 = vmul.f32 %v1230_v36, %v1460_v3 }
  0xe3   : > { %1247 = vrsqrt.f32 %v366_v17  ;;  %v1234_v43 = vpop.eup %1233  ;;  %v490_v53 = vmul.f32 %v1232_v42, %v1463_v4 }
  0xe4   : > { %v1236_v23 = vpop.eup %1235  ;;  %v499_v58 = vmul.f32 %v1234_v43, %v1472_v12 }
  0xe5   : > { %v1238_v1 = vpop.eup %1237  ;;  %v491_v59 = vmul.f32 %v1236_v23, %v1475_v13 }
  0xe6   : > { %v500_v13 = vmul.f32 %v1238_v1, %v1484_v20 }
  0xe9   : > { %1137 = vmatpush3.bf16.xpose.msk.msra.mxu0 %vm1526_vm1, %v1132_v54  ;;  %1158 = vmatpush3.bf16.xpose.msk.msra.mxu1 %vm1526_vm1, %v1132_v54  ;;  %v1240_v37 = vpop.eup %1239 }
  0xea   : > { %1140 = vmatprep.subr.msk.bf16.mxu0 %vm1526_vm1, %v1138_v14  ;;  %1151 = vmatprep.subr.msk.bf16.mxu1 %vm1526_vm1, %v1138_v14  ;;  %v1242_v46 = vpop.eup %1241  ;;  %v501_v3 = vmul.f32 %v1240_v37, %v1496_v30 }
  0xeb   : > { %v1244_v49 = vpop.eup %1243  ;;  %v493_v4 = vmul.f32 %v1242_v46, %v1499_v31 }
  0xec   : > { %v1246_v0 = vpop.eup %1245  ;;  %v492_v47 = vmul.f32 %v1244_v49, %v1487_v21  ;;  %v1642_v21 = vstv %s760_s24 }
  0xed   : > { %v1248_v2 = vpop.eup %1247  ;;  %v502_v6 = vmul.f32 %v1246_v0, %v1508_v38 }
  0xee   : > { %v494_v12 = vmul.f32 %v1248_v2, %v1511_v39  ;;  %v1273_v39 = vmov 0.0  }
  0xf1   : > { %1143 = vmatpush3.bf16.xpose.msk.msra.mxu0 %vm1526_vm1, %v1138_v14  ;;  %1159 = vmatpush3.bf16.xpose.msk.msra.mxu1 %vm1526_vm1, %v1138_v14 }
  0xf8   : > { %1073 = vmatmul.mubr.msk.f32.vlgmr.msra.gmra.mrb[0].mxu0 %vm310_vm0, %v488_v44  ;;  %1085 = vmatmul.mubr.msk.f32.vlgmr.msra.gmra.mrb[0].mxu1 %vm310_vm0, %v496_v45 }
  0xf9   : > { %1075 = vmatprep.mubr.msk.f32.mxu0 %vm310_vm0, %v489_v22  ;;  %1087 = vmatprep.mubr.msk.f32.mxu1 %vm310_vm0, %v497_v48 }
  0xfc   : > { %1076 = vmatmul.mubr.msk.f32.gmra.mrb[2].mxu0 %vm310_vm0, %v490_v53  ;;  %1088 = vmatmul.mubr.msk.f32.gmra.mrb[2].mxu1 %vm310_vm0, %v498_v52 }
  0xfd   : > { %1078 = vmatprep.mubr.msk.f32.mxu0 %vm310_vm0, %v491_v59  ;;  %1090 = vmatprep.mubr.msk.f32.mxu1 %vm310_vm0, %v499_v58 }
 0x100   : > { %1079 = vmatmul.mubr.msk.f32.gmra.mrb[4].mxu0 %vm310_vm0, %v492_v47  ;;  %1091 = vmatmul.mubr.msk.f32.gmra.mrb[4].mxu1 %vm310_vm0, %v500_v13 }
 0x101   : > { %1081 = vmatprep.mubr.msk.f32.mxu0 %vm310_vm0, %v493_v4  ;;  %1093 = vmatprep.mubr.msk.f32.mxu1 %vm310_vm0, %v501_v3 }
 0x104   : > { %1082 = vmatmul.mubr.msk.f32.gmra.mrb[6].mxu0 %vm310_vm0, %v494_v12  ;;  %1094 = vmatmul.mubr.msk.f32.gmra.mrb[6].mxu1 %vm310_vm0, %v502_v6 }
 0x1cb   : > { %v1074_v20 = vpop.f32.mrb[0].mxu0  ;;  %v1086_v30 = vpop.f32.mrb[0].mxu1 }
 0x1cc   : > { %vm763_vm2 = vcmp.gt.f32.partialorder %v1074_v20, %v1642_v21  ;;  %vm771_vm3 = vcmp.gt.f32.partialorder %v1086_v30, %v1642_v21  ;;  %v681_v31 = vpop.f32.mrb[1].mxu0  ;;  %v721_v38 = vpop.f32.mrb[1].mxu1 }
 0x1cd   : > { %v988_v29 = vsel %vm763_vm2, 1.0, %v1273_v39  ;;  %v996_v28 = vsel %vm771_vm3, 1.0, %v1273_v39  ;;  %vm762_vm4 = vcmp.gt.f32.partialorder %v681_v31, %v1642_v21  ;;  %vm770_vm5 = vcmp.gt.f32.partialorder %v721_v38, %v1642_v21 }
 0x1ce   : > { %811 = vst [vmem:[%s1648_s27 + $0x8] sm:$0xff] %v988_v29  ;;  %819 = vst [vmem:[%s1648_s27 + $0x48] sm:$0xff] %v996_v28  ;;  %v987_v50 = vsel %vm762_vm4, 1.0, %v1273_v39  ;;  %v995_v51 = vsel %vm770_vm5, 1.0, %v1273_v39 }
 0x1cf   : > { %810 = vst [vmem:[%s1648_s27] sm:$0xff] %v987_v50  ;;  %818 = vst [vmem:[%s1648_s27 + $0x40] sm:$0xff] %v995_v51  ;;  %v1077_v54 = vpop.f32.mrb[2].mxu0  ;;  %v1089_v55 = vpop.f32.mrb[2].mxu1 }
 0x1d0   : > { %vm765_vm6 = vcmp.gt.f32.partialorder %v1077_v54, %v1642_v21  ;;  %vm773_vm7 = vcmp.gt.f32.partialorder %v1089_v55, %v1642_v21  ;;  %v691_v56 = vpop.f32.mrb[3].mxu0  ;;  %v731_v57 = vpop.f32.mrb[3].mxu1 }
 0x1d1   : > { %v990_v60 = vsel %vm765_vm6, 1.0, %v1273_v39  ;;  %v998_v61 = vsel %vm773_vm7, 1.0, %v1273_v39  ;;  %vm764_vm8 = vcmp.gt.f32.partialorder %v691_v56, %v1642_v21  ;;  %vm772_vm9 = vcmp.gt.f32.partialorder %v731_v57, %v1642_v21 }
 0x1d2   : > { %813 = vst [vmem:[%s1648_s27 + $0x18] sm:$0xff] %v990_v60  ;;  %821 = vst [vmem:[%s1648_s27 + $0x58] sm:$0xff] %v998_v61  ;;  %v989_v34 = vsel %vm764_vm8, 1.0, %v1273_v39  ;;  %v997_v35 = vsel %vm772_vm9, 1.0, %v1273_v39 }
 0x1d3   : > { %812 = vst [vmem:[%s1648_s27 + $0x10] sm:$0xff] %v989_v34  ;;  %820 = vst [vmem:[%s1648_s27 + $0x50] sm:$0xff] %v997_v35  ;;  %v1080_v62 = vpop.f32.mrb[4].mxu0  ;;  %v1092_v63 = vpop.f32.mrb[4].mxu1 }
 0x1d4   : > { %vm767_vm10 = vcmp.gt.f32.partialorder %v1080_v62, %v1642_v21  ;;  %vm775_vm11 = vcmp.gt.f32.partialorder %v1092_v63, %v1642_v21  ;;  %v701_v8 = vpop.f32.mrb[5].mxu0  ;;  %v741_v9 = vpop.f32.mrb[5].mxu1 }
 0x1d5   : > { %v992_v5 = vsel %vm767_vm10, 1.0, %v1273_v39  ;;  %v1000_v7 = vsel %vm775_vm11, 1.0, %v1273_v39  ;;  %vm766_vm12 = vcmp.gt.f32.partialorder %v701_v8, %v1642_v21  ;;  %vm774_vm13 = vcmp.gt.f32.partialorder %v741_v9, %v1642_v21 }
 0x1d6   : > { %815 = vst [vmem:[%s1648_s27 + $0x28] sm:$0xff] %v992_v5  ;;  %823 = vst [vmem:[%s1648_s27 + $0x68] sm:$0xff] %v1000_v7  ;;  %v991_v10 = vsel %vm766_vm12, 1.0, %v1273_v39  ;;  %v999_v11 = vsel %vm774_vm13, 1.0, %v1273_v39 }
 0x1d7   : > { %814 = vst [vmem:[%s1648_s27 + $0x20] sm:$0xff] %v991_v10  ;;  %822 = vst [vmem:[%s1648_s27 + $0x60] sm:$0xff] %v999_v11  ;;  %v1083_v14 = vpop.f32.mrb[6].mxu0  ;;  %v1095_v15 = vpop.f32.mrb[6].mxu1 }
 0x1d8   : > { %vm769_vm14 = vcmp.gt.f32.partialorder %v1083_v14, %v1642_v21  ;;  %vm777_vm15 = vcmp.gt.f32.partialorder %v1095_v15, %v1642_v21  ;;  %v711_v40 = vpop.f32.mrb[7].mxu0  ;;  %v751_v41 = vpop.f32.mrb[7].mxu1 }
 0x1d9   : > { %v994_v18 = vsel %vm769_vm14, 1.0, %v1273_v39  ;;  %v1002_v19 = vsel %vm777_vm15, 1.0, %v1273_v39  ;;  %vm768_vm0 = vcmp.gt.f32.partialorder %v711_v40, %v1642_v21  ;;  %vm776_vm1 = vcmp.gt.f32.partialorder %v751_v41, %v1642_v21 }
 0x1da   : > { %817 = vst [vmem:[%s1648_s27 + $0x38] sm:$0xff] %v994_v18  ;;  %825 = vst [vmem:[%s1648_s27 + $0x78] sm:$0xff] %v1002_v19  ;;  %v993_v24 = vsel %vm768_vm0, 1.0, %v1273_v39  ;;  %v1001_v25 = vsel %vm776_vm1, 1.0, %v1273_v39 }
 0x1db   : > { %816 = vst [vmem:[%s1648_s27 + $0x30] sm:$0xff] %v993_v24  ;;  %824 = vst [vmem:[%s1648_s27 + $0x70] sm:$0xff] %v1001_v25 }
 0x1dc PF: > { %s14_s16 = sadd.s32 1, %s1271_s16   ;;  %s1697_s14 = smov %s1267_s15 }
 0x1dd   : > { %p11_p5 = scmp.ge.s32.totalorder %s14_s16, 4   ;;  %s1698_s15 = smov %s1700_s0 }
 0x1df   :  { %13 = sbr.rel (!%p11_p5) target bundleno = 2 (0x2), region = 65 }

</bundles_post_ra>
